<compile_context>
chip_gen: v6e
topology: v6e:2x2x1
jax: 0.10.0
libtpu: 0.0.40
codegen_flags: <defaults>
</compile_context>

<pallas_src>
import math
from functools import partial

import jax
import jax.numpy as jnp
from jax.experimental import pallas as pl
from jax.experimental.pallas import tpu as pltpu

INPUT_DIM = 4
HIDDEN1 = 64
HIDDEN2 = 32
OUTPUT_DIM = 2

LANE = 128  # TPU lane width; the batch tile must be a multiple of this.


def _round_up(n, m):
    return ((n + m - 1) // m) * m


def qnetwork_kernel(x_ref, w1_ref, b1_ref, w2_ref, b2_ref, w3_ref, b3_ref,
                    out_ref):
    """Feature-major fused MLP. x_ref: (4, TB) bf16, out_ref: (2, TB) f32."""
    x = x_ref[...]                                                      # (4, TB) bf16
    h1 = jnp.dot(w1_ref[...], x, preferred_element_type=jnp.float32)   # (64, TB) f32
    h1 = jnp.maximum(h1 + b1_ref[...], 0.0)                            # f32 bias+relu
    h2 = jnp.dot(w2_ref[...], h1.astype(jnp.bfloat16),
                 preferred_element_type=jnp.float32)                   # (32, TB) f32
    h2 = jnp.maximum(h2 + b2_ref[...], 0.0)
    h3 = jnp.dot(w3_ref[...], h2.astype(jnp.bfloat16),
                 preferred_element_type=jnp.float32)                   # (2, TB) f32
    out_ref[...] = (h3 + b3_ref[...]).astype(out_ref.dtype)            # lane-dense store


@partial(jax.jit, static_argnames=("tb",))
def qnetwork_forward(x, params, *, tb=2048):
    """x: (B, 4) f32. params: torch-layout (out,in) weights and (out,1) biases."""
    w1, b1, w2, b2, w3, b3 = params
    B = x.shape[0]

    # Batch tile: multiple of the lane width, no larger than needed.
    tb = max(LANE, min(_round_up(tb, LANE), _round_up(B, LANE)))
    grid = (pl.cdiv(B, tb),)

    # Feature-major, lane-dense, bf16 MXU operands. Biases stay f32.
    xt = x.T.astype(jnp.bfloat16)                                      # (4, B)
    w1b, w2b, w3b = (w.astype(jnp.bfloat16) for w in (w1, w2, w3))

    const = lambda a: pl.BlockSpec(a.shape, lambda i: (0,) * a.ndim)

    flops = 2 * B * (INPUT_DIM * HIDDEN1 + HIDDEN1 * HIDDEN2
                     + HIDDEN2 * OUTPUT_DIM)
    bytes_accessed = int(xt.size * 2 + B * OUTPUT_DIM * 4
                         + sum(w.size * 2 for w in (w1b, w2b, w3b))
                         + sum(b.size * 4 for b in (b1, b2, b3)))

    out_t = pl.pallas_call(
        qnetwork_kernel,
        out_shape=jax.ShapeDtypeStruct((OUTPUT_DIM, B), jnp.float32),
        grid=grid,
        in_specs=[
            pl.BlockSpec((INPUT_DIM, tb), lambda i: (0, i)),   # x tile (pipelined)
            const(w1b), const(b1),                             # VMEM-resident weights
            const(w2b), const(b2),
            const(w3b), const(b3),
        ],
        out_specs=pl.BlockSpec((OUTPUT_DIM, tb), lambda i: (0, i)),
        compiler_params=pltpu.CompilerParams(
            dimension_semantics=("parallel",)),
        cost_estimate=pl.CostEstimate(flops=flops, transcendentals=0,
                                      bytes_accessed=bytes_accessed),
    )(xt, w1b, b1, w2b, b2, w3b, b3)

    return out_t.T                                                     # (B, 2) f32


def init_params(key):
    """torch nn.Linear default init: U(-1/sqrt(fan_in), 1/sqrt(fan_in)),
    weight stored (out_features, in_features), bias stored (out_features, 1)."""
    def linear(key, fan_in, fan_out):
        kw, kb = jax.random.split(key)
        bound = 1.0 / math.sqrt(fan_in)
        w = jax.random.uniform(kw, (fan_out, fan_in), jnp.float32, -bound, bound)
        b = jax.random.uniform(kb, (fan_out, 1), jnp.float32, -bound, bound)
        return w, b

    k1, k2, k3 = jax.random.split(key, 3)
    w1, b1 = linear(k1, INPUT_DIM, HIDDEN1)
    w2, b2 = linear(k2, HIDDEN1, HIDDEN2)
    w3, b3 = linear(k3, HIDDEN2, OUTPUT_DIM)
    return (w1, b1, w2, b2, w3, b3)


def reference_forward(x, params):
    """Pure-JAX reference mirroring the kernel numerics
    (bf16 matmul operands, f32 accumulate, f32 bias/relu)."""
    w1, b1, w2, b2, w3, b3 = params
    bf = lambda a: a.astype(jnp.bfloat16).astype(jnp.float32)
    h1 = jnp.maximum(bf(x) @ bf(w1).T + b1.T, 0.0)
    h2 = jnp.maximum(bf(h1) @ bf(w2).T + b2.T, 0.0)
    return bf(h2) @ bf(w3).T + b3.T


if __name__ == "__main__":
    key = jax.random.PRNGKey(0)
    kp, kx = jax.random.split(key)
    params = init_params(kp)

    batch = 300  # small; deliberately not a multiple of the batch tile
    x = jax.random.normal(kx, (batch, INPUT_DIM), jnp.float32)

    # Small tile -> 3 pipelined grid steps + a masked partial final tile.
    out = qnetwork_forward(x, params, tb=128)
    out = jax.block_until_ready(out)

    ref = reference_forward(x, params)
    assert out.shape == (batch, OUTPUT_DIM)
    assert jnp.allclose(out, ref, atol=1e-4, rtol=1e-4), "mismatch vs reference"

    print("KERNEL_OK")
</pallas_src>

<mosaic_0001>
module attributes {stable_mosaic.version = 11 : i64} {
  func.func @qnetwork_kernel(%arg0: i32, %arg1: memref<4x128xbf16, #tpu.memory_space<vmem>>, %arg2: memref<64x4xbf16, #tpu.memory_space<vmem>>, %arg3: memref<64x1xf32, #tpu.memory_space<vmem>>, %arg4: memref<32x64xbf16, #tpu.memory_space<vmem>>, %arg5: memref<32x1xf32, #tpu.memory_space<vmem>>, %arg6: memref<2x32xbf16, #tpu.memory_space<vmem>>, %arg7: memref<2x1xf32, #tpu.memory_space<vmem>>, %arg8: memref<2x128xf32, #tpu.memory_space<vmem>>) attributes {dimension_semantics = [#tpu.dimension_semantics<parallel>], iteration_bounds = array<i64: 3>, scalar_prefetch = 0 : i64, scratch_operands = 0 : i64, tpu.core_type = #tpu.core_type<tc>, window_params = [{transform_indices = @transform_0, window_bounds = array<i64: 4, 128>}, {pipeline_mode = #tpu.pipeline_mode<synchronous>, transform_indices = @transform_1, window_bounds = array<i64: 64, 4>}, {pipeline_mode = #tpu.pipeline_mode<synchronous>, transform_indices = @transform_2, window_bounds = array<i64: 64, 1>}, {pipeline_mode = #tpu.pipeline_mode<synchronous>, transform_indices = @transform_3, window_bounds = array<i64: 32, 64>}, {pipeline_mode = #tpu.pipeline_mode<synchronous>, transform_indices = @transform_4, window_bounds = array<i64: 32, 1>}, {pipeline_mode = #tpu.pipeline_mode<synchronous>, transform_indices = @transform_5, window_bounds = array<i64: 2, 32>}, {pipeline_mode = #tpu.pipeline_mode<synchronous>, transform_indices = @transform_6, window_bounds = array<i64: 2, 1>}, {transform_indices = @transform_7, window_bounds = array<i64: 2, 128>}]} {
    %c0 = arith.constant 0 : index
    %c0_0 = arith.constant 0 : index
    %0 = vector.load %arg1[%c0, %c0_0] : memref<4x128xbf16, #tpu.memory_space<vmem>>, vector<4x128xbf16>
    %c0_1 = arith.constant 0 : index
    %c0_2 = arith.constant 0 : index
    %1 = vector.load %arg2[%c0_1, %c0_2] : memref<64x4xbf16, #tpu.memory_space<vmem>>, vector<64x4xbf16>
    %cst = arith.constant dense<0.000000e+00> : vector<64x128xf32>
    %2 = tpu.matmul %1, %0, %cst {dimension_numbers = #tpu.dot_dimension_numbers<[1], [0], [0], [1], [0, 0, 1, 1], [], []>} : vector<64x4xbf16>, vector<4x128xbf16>, vector<64x128xf32> -> vector<64x128xf32>
    %c0_3 = arith.constant 0 : index
    %c0_4 = arith.constant 0 : index
    %3 = vector.load %arg3[%c0_3, %c0_4] : memref<64x1xf32, #tpu.memory_space<vmem>>, vector<64x1xf32>
    %4 = vector.broadcast %3 : vector<64x1xf32> to vector<64x128xf32>
    %5 = arith.addf %2, %4 : vector<64x128xf32>
    %cst_5 = arith.constant 0.000000e+00 : f32
    %6 = vector.broadcast %cst_5 : f32 to vector<64x128xf32>
    %7 = arith.maximumf %5, %6 : vector<64x128xf32>
    %c0_6 = arith.constant 0 : index
    %c0_7 = arith.constant 0 : index
    %8 = vector.load %arg4[%c0_6, %c0_7] : memref<32x64xbf16, #tpu.memory_space<vmem>>, vector<32x64xbf16>
    %9 = arith.truncf %7 : vector<64x128xf32> to vector<64x128xbf16>
    %cst_8 = arith.constant dense<0.000000e+00> : vector<32x128xf32>
    %10 = tpu.matmul %8, %9, %cst_8 {dimension_numbers = #tpu.dot_dimension_numbers<[1], [0], [0], [1], [0, 0, 1, 1], [], []>} : vector<32x64xbf16>, vector<64x128xbf16>, vector<32x128xf32> -> vector<32x128xf32>
    %c0_9 = arith.constant 0 : index
    %c0_10 = arith.constant 0 : index
    %11 = vector.load %arg5[%c0_9, %c0_10] : memref<32x1xf32, #tpu.memory_space<vmem>>, vector<32x1xf32>
    %12 = vector.broadcast %11 : vector<32x1xf32> to vector<32x128xf32>
    %13 = arith.addf %10, %12 : vector<32x128xf32>
    %cst_11 = arith.constant 0.000000e+00 : f32
    %14 = vector.broadcast %cst_11 : f32 to vector<32x128xf32>
    %15 = arith.maximumf %13, %14 : vector<32x128xf32>
    %c0_12 = arith.constant 0 : index
    %c0_13 = arith.constant 0 : index
    %16 = vector.load %arg6[%c0_12, %c0_13] : memref<2x32xbf16, #tpu.memory_space<vmem>>, vector<2x32xbf16>
    %17 = arith.truncf %15 : vector<32x128xf32> to vector<32x128xbf16>
    %cst_14 = arith.constant dense<0.000000e+00> : vector<2x128xf32>
    %18 = tpu.matmul %16, %17, %cst_14 {dimension_numbers = #tpu.dot_dimension_numbers<[1], [0], [0], [1], [0, 0, 1, 1], [], []>} : vector<2x32xbf16>, vector<32x128xbf16>, vector<2x128xf32> -> vector<2x128xf32>
    %c0_15 = arith.constant 0 : index
    %c0_16 = arith.constant 0 : index
    %19 = vector.load %arg7[%c0_15, %c0_16] : memref<2x1xf32, #tpu.memory_space<vmem>>, vector<2x1xf32>
    %20 = vector.broadcast %19 : vector<2x1xf32> to vector<2x128xf32>
    %21 = arith.addf %18, %20 : vector<2x128xf32>
    %c0_17 = arith.constant 0 : index
    %c0_18 = arith.constant 0 : index
    %22 = vector.load %arg8[%c0_17, %c0_18] : memref<2x128xf32, #tpu.memory_space<vmem>>, vector<2x128xf32>
    tpu.vector_store %arg8[%c0_17, %c0_18], %21 {strides = array<i32>} : memref<2x128xf32, #tpu.memory_space<vmem>>, vector<2x128xf32>,
    return
  }
  func.func @transform_0(%arg0: i32) -> (i32, i32) {
    %c0_i32 = arith.constant 0 : i32
    %c0_i32_0 = arith.constant 0 : i32
    return %c0_i32, %arg0 : i32, i32
  }
  func.func @transform_1(%arg0: i32) -> (i32, i32) {
    %c0_i32 = arith.constant 0 : i32
    %c0_i32_0 = arith.constant 0 : i32
    %c0_i32_1 = arith.constant 0 : i32
    return %c0_i32, %c0_i32_0 : i32, i32
  }
  func.func @transform_2(%arg0: i32) -> (i32, i32) {
    %c0_i32 = arith.constant 0 : i32
    %c0_i32_0 = arith.constant 0 : i32
    %c0_i32_1 = arith.constant 0 : i32
    return %c0_i32, %c0_i32_0 : i32, i32
  }
  func.func @transform_3(%arg0: i32) -> (i32, i32) {
    %c0_i32 = arith.constant 0 : i32
    %c0_i32_0 = arith.constant 0 : i32
    %c0_i32_1 = arith.constant 0 : i32
    return %c0_i32, %c0_i32_0 : i32, i32
  }
  func.func @transform_4(%arg0: i32) -> (i32, i32) {
    %c0_i32 = arith.constant 0 : i32
    %c0_i32_0 = arith.constant 0 : i32
    %c0_i32_1 = arith.constant 0 : i32
    return %c0_i32, %c0_i32_0 : i32, i32
  }
  func.func @transform_5(%arg0: i32) -> (i32, i32) {
    %c0_i32 = arith.constant 0 : i32
    %c0_i32_0 = arith.constant 0 : i32
    %c0_i32_1 = arith.constant 0 : i32
    return %c0_i32, %c0_i32_0 : i32, i32
  }
  func.func @transform_6(%arg0: i32) -> (i32, i32) {
    %c0_i32 = arith.constant 0 : i32
    %c0_i32_0 = arith.constant 0 : i32
    %c0_i32_1 = arith.constant 0 : i32
    return %c0_i32, %c0_i32_0 : i32, i32
  }
  func.func @transform_7(%arg0: i32) -> (i32, i32) {
    %c0_i32 = arith.constant 0 : i32
    %c0_i32_0 = arith.constant 0 : i32
    return %c0_i32, %arg0 : i32, i32
  }
}

</mosaic_0001>

<bundles_post_ra>
// kernel: qnetwork_forward.1
= control target key start
LH: loop header
LB: loop body
LE: loop exit
PB: predicated region body
PF: predicated region fallthrough
CT: control target
= control target key end

     0   :  { %12 = vsyncpa [#allocation3], 0  ;;  %s1060_s0 = inlined_call_operand.vmem [shape: bf16[4,300], index: 0, kind: input, shape index: {}]   ;;  %s1061_s1 = inlined_call_operand.vmem [shape: bf16[64,4], index: 1, kind: input, shape index: {}]   ;;  %s1062_s2 = inlined_call_operand.vmem [shape: f32[64,1], index: 2, kind: input, shape index: {}]   ;;  %s1063_s3 = inlined_call_operand.vmem [shape: bf16[32,64], index: 3, kind: input, shape index: {}]   ;;  %s1064_s4 = inlined_call_operand.vmem [shape: f32[32,1], index: 4, kind: input, shape index: {}]   ;;  %s1065_s5 = inlined_call_operand.vmem [shape: bf16[2,32], index: 5, kind: input, shape index: {}]   ;;  %s1066_s6 = inlined_call_operand.vmem [shape: f32[2,1], index: 6, kind: input, shape index: {}]   ;;  %s1067_s7 = inlined_call_operand.hbm [shape: f32[2,300], index: 7, kind: output, shape index: {}]  }
   0x1   :  { %14 = vsyncpa [#allocation3 + $0x1], 0  ;;  %s895_s24 = smov 0   ;;  %s897_s25 = smov 0  }
   0x2   :  { %s899_s26 = smov 0   ;;  %s901_s27 = smov 0  }
   0x3 LB: > { %s916_s28 = sadd.s32 4294967295, %s849_s27   ;;  %s671_s29 = sadd.s32 4294967294, %s849_s27   ;;  %s849_s27 = sphi %s901_s27, %s1073_s27   ;;  %s845_s26 = sphi %s899_s26, %s1072_s26   ;;  %s841_s25 = sphi %s897_s25, %s1071_s25   ;;  %s837_s24 = sphi %s895_s24, %s1070_s24  }
   0x4   : > { %s920_s30 = sadd.s32 1, %s849_s27   ;;  %s179_s8 = sadd.s32 1, %s845_s26 }
   0x5   : > { %s176_s9 = ssub.s32 %s849_s27, %s920_s30  ;;  %p189_p0 = scmp.ne.s32.totalorder %s845_s26, %s841_s25 }
   0x6   : > { %p177_p1 = scmp.eq.s32.totalorder %s176_s9, 0  ;;  %p190_p2 = scmp.eq.s32.totalorder %s916_s28, 2 }
   0x7   : > { %p195_p3 = scmp.ne.s32.totalorder %s841_s25, %s837_s24  ;;  %p196_p4 = scmp.eq.s32.totalorder %s671_s29, 2 }
   0x8   : > { %s931_s10 = scalar_select %p177_p1, %s845_s26, %s179_s8  }
   0x9   : > { %p933_p5 = por %p190_p2, %p189_p0  ;;  %p937_p6 = por %p196_p4, %p195_p3 }
   0xa   : > { %p674_p7 = scmp.ge.s32.totalorder %s849_s27, 1  ;;  %p239_p8 = scmp.lt.s32.totalorder %s849_s27, 4 }
   0xc   : > { %p240_p9 = pnand %p674_p7, %p239_p8 }
   0xd   : > { %p270_p10 = scmp.lt.s32.totalorder (!%p240_p9), %s916_s28, 2  ;;  %s691_s18 = sshll.u32 (!%p240_p9), %s916_s28, 5 }
   0xe   : > { %243 = sbr.rel (%p240_p9) target bundleno = 674 (0x2a2), region = 48  ;;  %s1019_s23 = scalar_lea.hbm (!%p240_p9), %s1067_s7, %s691_s18 }
   0xf   : > { %s854_s8 = smov (!%p240_p9), [#allocation2]  }
  0x10   : > { %s793_s9 = sshll.u32 (!%p240_p9), %s854_s8, 4  ;;  %s794_s9 = int_to_ptr.vmem [resolvable:$false] %s793_s9 }
  0x11   : > { %s795_s13 = scalar_lea.vmem (!%p240_p9), %s794_s9, 64 }
  0x13   : > { %v783_v0 = vld [vmem:[%s1061_s1] sm:$0xff]   ;;  %vm352_vm0 = vcmask 31744   ;;  %s271_s15 = scalar_select %p270_p10, %s916_s28, 2  ;;  %vm365_vm1 = vcmask 1041408   ;;  %v851_v1 = vmov 0   ;;  %v290_v2 = vld [vmem:[%s1062_s2 + $0x30] sm:$0xff] }
  0x14   : > { %710 = vmatprep.mubr.msk.bf16.mxu0 %vm352_vm0, %v783_v0  ;;  %781 = vset.pattern.permute.xlu0 %v851_v1  ;;  %v288_v3 = vld [vmem:[%s1062_s2 + $0x20] sm:$0xff]  ;;  %v291_v5 = vld [vmem:[%s1062_s2 + $0x38] sm:$0xff]  ;;  %v784_v7 = vld [vmem:[%s1061_s1 + $0x8] sm:$0xff]   ;;  %vm484_vm2 = vcmask 523264   ;;  %v852_v58 = vmov 0.0   ;;  %vm853_vm3 = vmmov 0  }
  0x15   : > { %s676_s16 = sshll.u32 %s271_s15, 1  ;;  %782 = vset.pattern.permute.xlu1 %v851_v1  ;;  %324 = vperm.xlu0 %781, %v290_v2   ;;  %v289_v8 = vld [vmem:[%s1062_s2 + $0x28] sm:$0xff]  ;;  %v785_v9 = vld [vmem:[%s1061_s1 + $0x10] sm:$0xff]   ;;  %v287_v11 = vld [vmem:[%s1062_s2 + $0x18] sm:$0xff]  ;;  %vm553_vm4 = vcmask 261120  }
  0x16   : > { %s273_s21 = scalar_lea.vmem %s1060_s0, %s676_s16  ;;  %314 = vperm.xlu1 %782, %v288_v3   ;;  %v286_v10 = vld [vmem:[%s1062_s2 + $0x10] sm:$0xff]  ;;  %v284_v12 = vld [vmem:[%s1062_s2] sm:$0xff]  ;;  %v786_v13 = vld [vmem:[%s1061_s1 + $0x18] sm:$0xff]   ;;  %s267_s16 = sand.u32 1, %s841_s25  }
  0x17   : > { %v275_v4 = vld [vmem:[%s273_s21] sm:$0x3]  ;;  %v285_v14 = vld [vmem:[%s1062_s2 + $0x8] sm:$0xff]  ;;  %v452_v15 = vld [vmem:[%s1064_s4 + $0x10] sm:$0xff]  ;;  %s675_s17 = sshll.u32 %s267_s16, 1  ;;  %s599_s29 = scalar_lea.sflag [#allocation3], %s267_s16 }
  0x18   : > { %738 = vmatprep.subr.msk.bf16.mxu0 %vm365_vm1, %v275_v4  ;;  %v367_v6 = vsel %vm365_vm1, %v275_v4, 0  ;;  %v453_v16 = vld [vmem:[%s1064_s4 + $0x18] sm:$0xff]  ;;  %v450_v17 = vld [vmem:[%s1064_s4] sm:$0xff]  ;;  %v451_v18 = vld [vmem:[%s1064_s4 + $0x8] sm:$0xff]  ;;  %s269_s19 = scalar_lea.vmem [#allocation2], %s675_s17 }
  0x19   : > { %709 = vmatpush3.bf16.msra.mxu0 %v367_v6  ;;  %329 = vperm.xlu0 %781, %v291_v5   ;;  %v547_v19 = vld [vmem:[%s1066_s6] sm:$0x3]  ;;  %v788_v57 = vld [vmem:[%s1063_s3 + $0x8] sm:$0xff]   ;;  %s612_s20 = sshll.u32 %s269_s19, 4  ;;  %s1021_s20 = int_to_ptr.vmem [resolvable:$true] %s612_s20 }
  0x1a   : > { %319 = vperm.xlu1 %782, %v289_v8   ;;  %v787_v20 = vld [vmem:[%s1063_s3] sm:$0xff]   ;;  %730 = vmatprep.subr.bf16.mxu0 %v852_v58  ;;  %s789_s28 = scalar_lea.vmem %s1021_s20, 32  ;;  %p796_p0 = scmp.lt.s32.totalorder %s1021_s20, %s794_s9 }
  0x1b   : > { %726 = vmatprep.mubr.msk.bf16.mxu1 %vm484_vm2, %v787_v20  ;;  %p790_p11 = scmp.ne.s32.totalorder %s1021_s20, %s789_s28  ;;  %p797_p1 = scmp.lt.s32.totalorder %s795_s13, %s789_s28 }
  0x1c   : > { %711 = vmatmul.mubr.msk.bf16.vlgmr.msra.gmra.mxu0 %vm352_vm0, %v784_v7 }
  0x1d   : > { %714 = vmatprep.mubr.msk.bf16.mxu0 %vm352_vm0, %v785_v9  ;;  %304 = vperm.xlu0 %781, %v286_v10   ;;  %p791_p12 = pnand %p790_p11, %p933_p5  ;;  %p798_p2 = por %p797_p1, %p796_p0 }
  0x1e   : > { %309 = vperm.xlu1 %782, %v287_v11  }
  0x1f   : > { %p792_p13 = pneg %p791_p12 }
  0x21   : > { %294 = vperm.xlu0 %781, %v284_v12   ;;  %p799_p3 = pnand %p798_p2, %p792_p13 }
  0x22   : > { %299 = vperm.xlu1 %782, %v285_v14  }
  0x24   : > { %715 = vmatmul.mubr.msk.bf16.gmra.mxu0 %vm352_vm0, %v786_v13  ;;  %v544_v13 = vld [vmem:[%s1065_s5] sm:$0x1] }
  0x25   : > { %466 = vperm.xlu0 %781, %v452_v15   ;;  %734 = vmatprep.mubr.msk.bf16.mxu0 %vm853_vm3, %v852_v58 }
  0x26   : > { %471 = vperm.xlu1 %782, %v453_v16  }
  0x29   : > { %456 = vperm.xlu0 %781, %v450_v17  }
  0x2a   : > { %461 = vperm.xlu1 %782, %v451_v18  }
  0x2d   : > { %550 = vperm.xlu0 %781, %v547_v19  }
  0x90   : > { %v325_v23 = vpop.permute.xlu0 %324 }
  0x91   : > { %v315_v21 = vpop.permute.xlu1 %314 }
  0x94   : > { %v330_v28 = vpop.permute.xlu0 %329 }
  0x95   : > { %v320_v26 = vpop.permute.xlu1 %319 }
  0x98   : > { %v305_v36 = vpop.permute.xlu0 %304 }
  0x99   : > { %v310_v32 = vpop.permute.xlu1 %309 }
  0x9c   : > { %v295_v50 = vpop.permute.xlu0 %294 }
  0x9d   : > { %v300_v46 = vpop.permute.xlu1 %299 }
  0xa0   : > { %v467_v59 = vpop.permute.xlu0 %466 }
  0xa1   : > { %v472_v60 = vpop.permute.xlu1 %471 }
  0xa4   : > { %v457_v1 = vpop.permute.xlu0 %456 }
  0xa5   : > { %v462_v3 = vpop.permute.xlu1 %461 }
  0xa8   : > { %v551_v14 = vpop.permute.xlu0 %550 }
  0xdc   : > { %v712_v22 = vpop.f32.mrf.mxu0 }
  0xdd   : > { %v412_v42 = vadd.f32 %v712_v22, %v305_v36 }
  0xde   : > { %v403_v24 = vpop.f32.mrf.mxu0 }
  0xdf   : > { %v436_v51 = vmax.f32 %v412_v42, 0.0  ;;  %v404_v52 = vadd.f32 %v403_v24, %v295_v50 }
  0xe0   : > { %v713_v25 = vpop.f32.mrf.mxu0 }
  0xe1   : > { %v415_v38 = vadd.f32 %v713_v25, %v310_v32  ;;  %v434_v55 = vmax.f32 %v404_v52, 0.0 }
  0xe2   : > { %v406_v27 = vpop.f32.mrf.mxu0 }
  0xe3   : > { %v437_v47 = vmax.f32 %v415_v38, 0.0  ;;  %v407_v48 = vadd.f32 %v406_v27, %v300_v46 }
  0xe4   : > { %v716_v29 = vpop.f32.mrf.mxu0 }
  0xe5   : > { %v428_v31 = vadd.f32 %v716_v29, %v325_v23  ;;  %v447_v53 = vpack.c.bf16 %v437_v47, %v436_v51  ;;  %v435_v54 = vmax.f32 %v407_v48, 0.0 }
  0xe6   : > { %v419_v30 = vpop.f32.mrf.mxu0 }
  0xe7   : > { %v420_v34 = vadd.f32 %v419_v30, %v315_v21  ;;  %v440_v39 = vmax.f32 %v428_v31, 0.0  ;;  %v446_v56 = vpack.c.bf16 %v435_v54, %v434_v55 }
  0xe8   : > { %v717_v33 = vpop.f32.mrf.mxu0 }
  0xe9   : > { %v431_v35 = vadd.f32 %v717_v33, %v330_v28  ;;  %v438_v43 = vmax.f32 %v420_v34, 0.0 }
  0xea   : > { %v422_v37 = vpop.f32.mrf.mxu0 }
  0xeb   : > { %v441_v40 = vmax.f32 %v431_v35, 0.0  ;;  %v423_v41 = vadd.f32 %v422_v37, %v320_v26 }
  0xed   : > { %v439_v44 = vmax.f32 %v423_v41, 0.0  ;;  %v449_v45 = vpack.c.bf16 %v441_v40, %v440_v39 }
  0xef   : > { %v448_v49 = vpack.c.bf16 %v439_v44, %v438_v43  ;;  %718 = vmatprep.subr.bf16.mxu1 %v449_v45 }
  0xf0   : > { %719 = vmatpush3.bf16.msra.mxu1 %v449_v45 }
  0xf1   : > { %720 = vmatprep.subr.bf16.mxu1 %v448_v49 }
  0xf4   : > { %721 = vmatpush3.bf16.msra.mxu1 %v448_v49 }
  0xf5   : > { %722 = vmatprep.subr.bf16.mxu1 %v447_v53 }
  0xf8   : > { %723 = vmatpush3.bf16.msra.mxu1 %v447_v53 }
  0xf9   : > { %724 = vmatprep.subr.bf16.mxu1 %v446_v56 }
  0xfc   : > { %725 = vmatpush3.bf16.msra.mxu1 %v446_v56 }
  0xff   : > { %727 = vmatmul.mubr.msk.bf16.vlgmr.msra.gmra.mxu1 %vm484_vm2, %v788_v57 }
 0x1bf   : > { %v728_v61 = vpop.f32.mrf.mxu1 }
 0x1c0   : > { %v534_v63 = vadd.f32 %v728_v61, %v467_v59 }
 0x1c1   : > { %v525_v62 = vpop.f32.mrf.mxu1 }
 0x1c2   : > { %v542_v5 = vmax.f32 %v534_v63, 0.0  ;;  %v526_v6 = vadd.f32 %v525_v62, %v457_v1 }
 0x1c3   : > { %v729_v0 = vpop.f32.mrf.mxu1 }
 0x1c4   : > { %v537_v2 = vadd.f32 %v729_v0, %v472_v60  ;;  %v540_v11 = vmax.f32 %v526_v6, 0.0 }
 0x1c5   : > { %v528_v4 = vpop.f32.mrf.mxu1 }
 0x1c6   : > { %v543_v7 = vmax.f32 %v537_v2, 0.0  ;;  %v529_v8 = vadd.f32 %v528_v4, %v462_v3 }
 0x1c8   : > { %v546_v9 = vpack.c.bf16 %v543_v7, %v542_v5  ;;  %v541_v10 = vmax.f32 %v529_v8, 0.0 }
 0x1ca   : > { %731 = vmatpush3.bf16.msra.mxu0 %v546_v9  ;;  %v545_v12 = vpack.c.bf16 %v541_v10, %v540_v11 }
 0x1cb   : > { %732 = vmatprep.subr.bf16.mxu0 %v852_v58 }
 0x1ce   : > { %733 = vmatpush3.bf16.msra.mxu0 %v545_v12 }
 0x1d1   : > { %735 = vmatmul.mubr.msk.bf16.vlgmr.msra.gmra.mxu0 %vm553_vm4, %v544_v13 }
 0x291   : > { %v591_v15 = vpop.f32.mrf.mxu0 }
 0x292   : > { %v592_v16 = vadd.f32 %v591_v15, %v551_v14 }
 0x293   : > { %v736_v17 = vpop.f32.mrf.mxu0 }
 0x294   : > { %597 = vst [vmem:[%s269_s19] sm:$0x3] %v592_v16 }
 0x295   : > { %v594_v18 = vpop.f32.mrf.mxu0 }
 0x296   : > { %802 = shalt.err (!%p799_p3)
}
 0x297   : > { %s803_s14 = scalar_lea.hbm %s1019_s23, 32  ;;  %s807_s17 = scalar_lea.hbm %s1067_s7, 96 }
 0x298   : > { %p804_p4 = scmp.ne.s32.totalorder %s1019_s23, %s803_s14  ;;  %p808_p9 = scmp.lt.s32.totalorder %s1019_s23, %s1067_s7 }
 0x299   : > { %p809_p10 = scmp.lt.s32.totalorder %s807_s17, %s803_s14 }
 0x29a   : > { %p805_p7 = pnand %p804_p4, %p933_p5 }
 0x29b   : > { %p810_p11 = por %p809_p10, %p808_p9 }
 0x29c   : > { %p806_p8 = pneg %p805_p7 }
 0x29e   : > { %p811_p12 = pnand %p810_p11, %p806_p8 }
 0x2a0   : > { %814 = shalt.err (!%p811_p12)
}
 0x2a1   : > { %739 = dma.vmem_to_hbm [thread:$0]  (%p933_p5), %s1021_s20, 32, %s1019_s23, %s599_s29   ;;  %v737_v19 = vpop.f32.mrf.mxu0 }
 0x2a2 PF: > { %p745_p13 = scmp.ge.s32.totalorder %s849_s27, 2  ;;  %s624_s21 = sand.u32 1, %s837_s24  }
 0x2a3   : > { %s625_s22 = scalar_lea.sflag [#allocation3], %s624_s21 }
 0x2a4   : > { %p742_p0 = pnand %p745_p13, %p937_p6 }
 0x2a6   : > { %p743_p1 = pneg %p742_p0 }
 0x2a8   : > { %832 = dma.done.wait (%p743_p1), %s625_s22, 32  }
 0x2a9   : > { %834 = vsyncadd (%p743_p1), %s625_s22, 4294967264  ;;  %p17_p2 = scmp.ge.s32.totalorder %s920_s30, 5   ;;  %s1070_s24 = smov %s841_s25 }
 0x2aa   : > { %s1071_s25 = smov %s845_s26  ;;  %s1072_s26 = smov %s931_s10 }
 0x2ab   : > { %s1073_s27 = smov %s920_s30  ;;  %19 = sbr.rel (!%p17_p2) target bundleno = 3 (0x3), region = 83 }
 0x2b0   :  { %630 = vsyncpa [#allocation3], 1 }
 0x2b1   :  { %632 = vsyncpa [#allocation3 + $0x1], 1 }

</bundles_post_ra>
